<compile_context>
chip_gen: v7x
topology: tpu7x:2x2x1
jax: 0.10.0
libtpu: 0.0.40
codegen_flags: <defaults>
</compile_context>

<pallas_src>
import math
from functools import partial

import jax
import jax.numpy as jnp
from jax import lax
from jax.experimental import pallas as pl
from jax.experimental.pallas import tpu as pltpu


def _pwff_kernel(eps, x_ref, w1_ref, b1_ref, w2_ref, b2_ref, g_ref, beta_ref,
                 o_ref):
    # x_ref block: (tm, d_in) f32; W1/W2 are bf16, resident in VMEM.
    x = x_ref[...]                                            # f32 for residual/LN
    x_bf = x.astype(jnp.bfloat16)                             # bf16 MXU operand

    # FFN: relu(x @ W1 + b1) @ W2 + b2   (bf16 in, f32 accumulate).
    h = jnp.dot(x_bf, w1_ref[...],
                preferred_element_type=jnp.float32) + b1_ref[...]
    h = jnp.maximum(h, 0.0)
    z = jnp.dot(h.astype(jnp.bfloat16), w2_ref[...],
                preferred_element_type=jnp.float32) + b2_ref[...]

    # TODO(synk): nn.Dropout(p=0.1) -- identity in eval/inference mode.

    # Residual + LayerNorm over the channel (lane) axis, single-pass stats.
    y = z + x
    mean = jnp.mean(y, axis=-1, keepdims=True)
    meansq = jnp.mean(y * y, axis=-1, keepdims=True)
    var = jnp.maximum(meansq - mean * mean, 0.0)
    inv = lax.rsqrt(var + eps)                                # EUP slot
    scale = inv * g_ref[...]                                  # gamma folded in
    o_ref[...] = ((y - mean) * scale + beta_ref[...]).astype(o_ref.dtype)


def pwff_forward(x, params, *, eps=1e-5, tile_m=512):
    """x: (B, L, d_in) float32.  params = (W1, b1, W2, b2, gamma, beta) with
    W1: (d_in, d_hid), W2: (d_hid, d_in).  Returns (B, L, d_in) float32."""
    w1, b1, w2, b2, gamma, beta = params
    B, L, d_in = x.shape
    d_hid = w1.shape[1]

    # Collapse (B, L) into a single row axis -> one lane-major slab.
    M = B * L
    x2 = x.reshape(M, d_in)

    # Row-tile selection: sublane-aligned (multiple of 8) unless it spans the
    # full row extent.  No explicit padding: Pallas masks the ragged last block.
    tm = min(tile_m, M)
    if tm < M:
        tm = max(8, (tm // 8) * 8)
    # v7x: make sure the "parallel" axis has >= 2 row tiles so both
    # TensorCores get work (no-op on v5e/v6e's single TC).
    if pl.cdiv(M, tm) < 2 and M >= 16:
        tm = ((pl.cdiv(M, 2) + 7) // 8) * 8
    grid = (pl.cdiv(M, tm),)

    # Explicit scoped-VMEM budget: bf16 weights (single-buffered) + 2x input
    # + 2x output blocks + h intermediates (f32 + bf16 copies), with headroom.
    bytes_w = 2 * d_in * d_hid * 2                       # W1 + W2, bf16, x1 buffer
    bytes_io = 2 * tm * d_in * 4 + 2 * tm * d_in * 4     # x in + out, double-buffered
    bytes_h = tm * d_hid * 4 + tm * d_hid * 2 + tm * d_in * 2
    bytes_small = 4 * 8 * max(d_in, d_hid, 128) * 4      # biases/gamma/beta tiles
    vmem_limit = int(min(max(2 * (bytes_w + bytes_io + bytes_h + bytes_small),
                             32 * 1024 * 1024),
                         64 * 1024 * 1024))

    cost = pl.CostEstimate(
        flops=4 * M * d_in * d_hid + 12 * M * d_in,
        transcendentals=M,
        bytes_accessed=2 * M * d_in * 4 + bytes_w,
    )

    const = lambda i: (0, 0)
    resident = pl.Buffered(1)   # constant index_map -> no need to double-buffer

    out = pl.pallas_call(
        partial(_pwff_kernel, eps),
        out_shape=jax.ShapeDtypeStruct((M, d_in), jnp.float32),
        grid=grid,
        in_specs=[
            pl.BlockSpec((tm, d_in), lambda i: (i, 0)),                       # x rows
            pl.BlockSpec((d_in, d_hid), const, pipeline_mode=resident),       # W1 (bf16)
            pl.BlockSpec((1, d_hid), const, pipeline_mode=resident),          # b1
            pl.BlockSpec((d_hid, d_in), const, pipeline_mode=resident),       # W2 (bf16)
            pl.BlockSpec((1, d_in), const, pipeline_mode=resident),           # b2
            pl.BlockSpec((1, d_in), const, pipeline_mode=resident),           # gamma
            pl.BlockSpec((1, d_in), const, pipeline_mode=resident),           # beta
        ],
        out_specs=pl.BlockSpec((tm, d_in), lambda i: (i, 0)),
        compiler_params=pltpu.CompilerParams(
            dimension_semantics=("parallel",),
            vmem_limit_bytes=vmem_limit),
        cost_estimate=cost,
    )(x2,
      w1.astype(jnp.bfloat16), b1.reshape(1, d_hid),
      w2.astype(jnp.bfloat16), b2.reshape(1, d_in),
      gamma.reshape(1, d_in), beta.reshape(1, d_in))

    return out.reshape(B, L, d_in)


def pwff_reference(x, params, eps=1e-5):
    """Pure-JAX f32 replica of the PyTorch forward (eval mode)."""
    w1, b1, w2, b2, gamma, beta = params
    h = jax.nn.relu(jnp.einsum('bld,dh->blh', x, w1) + b1)
    z = jnp.einsum('blh,hd->bld', h, w2) + b2
    y = z + x
    mu = jnp.mean(y, axis=-1, keepdims=True)
    var = jnp.mean((y - mu) ** 2, axis=-1, keepdims=True)
    return (y - mu) / jnp.sqrt(var + eps) * gamma + beta


if __name__ == "__main__":
    # Small shapes consistent with the module: (batch, seq, d_in), hidden d_hid.
    B, L, d_in, d_hid = 2, 16, 32, 64

    key = jax.random.PRNGKey(0)
    kx, k1, kb1, k2, kb2, kg, kb = jax.random.split(key, 7)

    x = jax.random.normal(kx, (B, L, d_in), dtype=jnp.float32)

    # Conv1d(k=1) weights stored as (in, out) matrices; LayerNorm gamma/beta.
    params = (
        0.1 * jax.random.normal(k1, (d_in, d_hid), dtype=jnp.float32),
        0.1 * jax.random.normal(kb1, (d_hid,), dtype=jnp.float32),
        0.1 * jax.random.normal(k2, (d_hid, d_in), dtype=jnp.float32),
        0.1 * jax.random.normal(kb2, (d_in,), dtype=jnp.float32),
        1.0 + 0.1 * jax.random.normal(kg, (d_in,), dtype=jnp.float32),
        0.1 * jax.random.normal(kb, (d_in,), dtype=jnp.float32),
    )

    out = pwff_forward(x, params)
    out = jax.block_until_ready(out)

    ref = pwff_reference(x, params)
    assert out.shape == (B, L, d_in)
    # bf16 MXU operands -> compare against the f32 reference with a looser
    # tolerance (LN renormalization keeps relative error small).
    assert jnp.allclose(out, ref, rtol=3e-2, atol=3e-2), "mismatch vs reference"

    print("KERNEL_OK")
</pallas_src>

<mosaic_0001>
module attributes {stable_mosaic.version = 11 : i64} {
  func.func @_pwff_kernel(%arg0: i32, %arg1: memref<16x32xf32, #tpu.memory_space<vmem>>, %arg2: memref<32x64xbf16, #tpu.memory_space<vmem>>, %arg3: memref<1x64xf32, #tpu.memory_space<vmem>>, %arg4: memref<64x32xbf16, #tpu.memory_space<vmem>>, %arg5: memref<1x32xf32, #tpu.memory_space<vmem>>, %arg6: memref<1x32xf32, #tpu.memory_space<vmem>>, %arg7: memref<1x32xf32, #tpu.memory_space<vmem>>, %arg8: memref<16x32xf32, #tpu.memory_space<vmem>>) attributes {dimension_semantics = [#tpu.dimension_semantics<parallel>], iteration_bounds = array<i64: 2>, scalar_prefetch = 0 : i64, scratch_operands = 0 : i64, tpu.core_type = #tpu.core_type<tc>, window_params = [{transform_indices = @transform_0, window_bounds = array<i64: 16, 32>}, {pipeline_mode = #tpu.pipeline_mode<synchronous>, transform_indices = @transform_1, window_bounds = array<i64: 32, 64>}, {pipeline_mode = #tpu.pipeline_mode<synchronous>, transform_indices = @transform_2, window_bounds = array<i64: 1, 64>}, {pipeline_mode = #tpu.pipeline_mode<synchronous>, transform_indices = @transform_3, window_bounds = array<i64: 64, 32>}, {pipeline_mode = #tpu.pipeline_mode<synchronous>, transform_indices = @transform_4, window_bounds = array<i64: 1, 32>}, {pipeline_mode = #tpu.pipeline_mode<synchronous>, transform_indices = @transform_5, window_bounds = array<i64: 1, 32>}, {pipeline_mode = #tpu.pipeline_mode<synchronous>, transform_indices = @transform_6, window_bounds = array<i64: 1, 32>}, {transform_indices = @transform_7, window_bounds = array<i64: 16, 32>}]} {
    %c0 = arith.constant 0 : index
    %c0_0 = arith.constant 0 : index
    %0 = vector.load %arg1[%c0, %c0_0] : memref<16x32xf32, #tpu.memory_space<vmem>>, vector<16x32xf32>
    %1 = arith.truncf %0 : vector<16x32xf32> to vector<16x32xbf16>
    %c0_1 = arith.constant 0 : index
    %c0_2 = arith.constant 0 : index
    %2 = vector.load %arg2[%c0_1, %c0_2] : memref<32x64xbf16, #tpu.memory_space<vmem>>, vector<32x64xbf16>
    %cst = arith.constant dense<0.000000e+00> : vector<16x64xf32>
    %3 = tpu.matmul %1, %2, %cst {dimension_numbers = #tpu.dot_dimension_numbers<[1], [0], [0], [1], [0, 0, 1, 1], [], []>} : vector<16x32xbf16>, vector<32x64xbf16>, vector<16x64xf32> -> vector<16x64xf32>
    %c0_3 = arith.constant 0 : index
    %c0_4 = arith.constant 0 : index
    %4 = vector.load %arg3[%c0_3, %c0_4] : memref<1x64xf32, #tpu.memory_space<vmem>>, vector<1x64xf32>
    %5 = vector.broadcast %4 : vector<1x64xf32> to vector<16x64xf32>
    %6 = arith.addf %3, %5 : vector<16x64xf32>
    %cst_5 = arith.constant 0.000000e+00 : f32
    %7 = vector.broadcast %cst_5 : f32 to vector<16x64xf32>
    %8 = arith.maximumf %6, %7 : vector<16x64xf32>
    %9 = arith.truncf %8 : vector<16x64xf32> to vector<16x64xbf16>
    %c0_6 = arith.constant 0 : index
    %c0_7 = arith.constant 0 : index
    %10 = vector.load %arg4[%c0_6, %c0_7] : memref<64x32xbf16, #tpu.memory_space<vmem>>, vector<64x32xbf16>
    %cst_8 = arith.constant dense<0.000000e+00> : vector<16x32xf32>
    %11 = tpu.matmul %9, %10, %cst_8 {dimension_numbers = #tpu.dot_dimension_numbers<[1], [0], [0], [1], [0, 0, 1, 1], [], []>} : vector<16x64xbf16>, vector<64x32xbf16>, vector<16x32xf32> -> vector<16x32xf32>
    %c0_9 = arith.constant 0 : index
    %c0_10 = arith.constant 0 : index
    %12 = vector.load %arg5[%c0_9, %c0_10] : memref<1x32xf32, #tpu.memory_space<vmem>>, vector<1x32xf32>
    %13 = vector.broadcast %12 : vector<1x32xf32> to vector<16x32xf32>
    %14 = arith.addf %11, %13 : vector<16x32xf32>
    %15 = arith.addf %14, %0 : vector<16x32xf32>
    %cst_11 = arith.constant dense<0.000000e+00> : vector<16xf32>
    %16 = vector.multi_reduction <add>, %15, %cst_11 [1] : vector<16x32xf32> to vector<16xf32>
    %17 = vector.shape_cast %16 : vector<16xf32> to vector<16x1xf32>
    %cst_12 = arith.constant 3.200000e+01 : f32
    %18 = vector.broadcast %cst_12 : f32 to vector<16x1xf32>
    %19 = arith.divf %17, %18 : vector<16x1xf32>
    %20 = arith.mulf %15, %15 : vector<16x32xf32>
    %cst_13 = arith.constant dense<0.000000e+00> : vector<16xf32>
    %21 = vector.multi_reduction <add>, %20, %cst_13 [1] : vector<16x32xf32> to vector<16xf32>
    %22 = vector.shape_cast %21 : vector<16xf32> to vector<16x1xf32>
    %cst_14 = arith.constant 3.200000e+01 : f32
    %23 = vector.broadcast %cst_14 : f32 to vector<16x1xf32>
    %24 = arith.divf %22, %23 : vector<16x1xf32>
    %25 = arith.mulf %19, %19 : vector<16x1xf32>
    %26 = arith.subf %24, %25 : vector<16x1xf32>
    %cst_15 = arith.constant 0.000000e+00 : f32
    %27 = vector.broadcast %cst_15 : f32 to vector<16x1xf32>
    %28 = arith.maximumf %26, %27 : vector<16x1xf32>
    %cst_16 = arith.constant 9.99999974E-6 : f32
    %29 = vector.broadcast %cst_16 : f32 to vector<16x1xf32>
    %30 = arith.addf %28, %29 : vector<16x1xf32>
    %31 = math.rsqrt %30 : vector<16x1xf32>
    %c0_17 = arith.constant 0 : index
    %c0_18 = arith.constant 0 : index
    %32 = vector.load %arg6[%c0_17, %c0_18] : memref<1x32xf32, #tpu.memory_space<vmem>>, vector<1x32xf32>
    %33 = vector.broadcast %31 : vector<16x1xf32> to vector<16x32xf32>
    %34 = vector.broadcast %32 : vector<1x32xf32> to vector<16x32xf32>
    %35 = arith.mulf %33, %34 : vector<16x32xf32>
    %36 = vector.broadcast %19 : vector<16x1xf32> to vector<16x32xf32>
    %37 = arith.subf %15, %36 : vector<16x32xf32>
    %38 = arith.mulf %37, %35 : vector<16x32xf32>
    %c0_19 = arith.constant 0 : index
    %c0_20 = arith.constant 0 : index
    %39 = vector.load %arg7[%c0_19, %c0_20] : memref<1x32xf32, #tpu.memory_space<vmem>>, vector<1x32xf32>
    %40 = vector.broadcast %39 : vector<1x32xf32> to vector<16x32xf32>
    %41 = arith.addf %38, %40 : vector<16x32xf32>
    %c0_21 = arith.constant 0 : index
    %c0_22 = arith.constant 0 : index
    %42 = vector.load %arg8[%c0_21, %c0_22] : memref<16x32xf32, #tpu.memory_space<vmem>>, vector<16x32xf32>
    tpu.vector_store %arg8[%c0_21, %c0_22], %41 {strides = array<i32>} : memref<16x32xf32, #tpu.memory_space<vmem>>, vector<16x32xf32>,
    return
  }
  func.func @transform_0(%arg0: i32) -> (i32, i32) {
    %c0_i32 = arith.constant 0 : i32
    %c0_i32_0 = arith.constant 0 : i32
    return %arg0, %c0_i32 : i32, i32
  }
  func.func @transform_1(%arg0: i32) -> (i32, i32) {
    %c0_i32 = arith.constant 0 : i32
    %c0_i32_0 = arith.constant 0 : i32
    %c0_i32_1 = arith.constant 0 : i32
    return %c0_i32, %c0_i32_0 : i32, i32
  }
  func.func @transform_2(%arg0: i32) -> (i32, i32) {
    %c0_i32 = arith.constant 0 : i32
    %c0_i32_0 = arith.constant 0 : i32
    %c0_i32_1 = arith.constant 0 : i32
    return %c0_i32, %c0_i32_0 : i32, i32
  }
  func.func @transform_3(%arg0: i32) -> (i32, i32) {
    %c0_i32 = arith.constant 0 : i32
    %c0_i32_0 = arith.constant 0 : i32
    %c0_i32_1 = arith.constant 0 : i32
    return %c0_i32, %c0_i32_0 : i32, i32
  }
  func.func @transform_4(%arg0: i32) -> (i32, i32) {
    %c0_i32 = arith.constant 0 : i32
    %c0_i32_0 = arith.constant 0 : i32
    %c0_i32_1 = arith.constant 0 : i32
    return %c0_i32, %c0_i32_0 : i32, i32
  }
  func.func @transform_5(%arg0: i32) -> (i32, i32) {
    %c0_i32 = arith.constant 0 : i32
    %c0_i32_0 = arith.constant 0 : i32
    %c0_i32_1 = arith.constant 0 : i32
    return %c0_i32, %c0_i32_0 : i32, i32
  }
  func.func @transform_6(%arg0: i32) -> (i32, i32) {
    %c0_i32 = arith.constant 0 : i32
    %c0_i32_0 = arith.constant 0 : i32
    %c0_i32_1 = arith.constant 0 : i32
    return %c0_i32, %c0_i32_0 : i32, i32
  }
  func.func @transform_7(%arg0: i32) -> (i32, i32) {
    %c0_i32 = arith.constant 0 : i32
    %c0_i32_0 = arith.constant 0 : i32
    return %arg0, %c0_i32 : i32, i32
  }
}

</mosaic_0001>

<bundles_post_ra>
// kernel: tpu_custom_call.1
= control target key start
LH: loop header
LB: loop body
LE: loop exit
PB: predicated region body
PF: predicated region fallthrough
CT: control target
= control target key end

     0   :  { %12 = vsyncpa [#allocation3], 0  ;;  %s924_s0 = inlined_call_operand.vmem [shape: f32[32,32], index: 0, kind: input, shape index: {}]   ;;  %s925_s1 = inlined_call_operand.vmem [shape: bf16[32,64], index: 1, kind: input, shape index: {}]   ;;  %s926_s2 = inlined_call_operand.vmem [shape: f32[1,64], index: 2, kind: input, shape index: {}]   ;;  %s927_s3 = inlined_call_operand.vmem [shape: bf16[64,32], index: 3, kind: input, shape index: {}]   ;;  %s928_s4 = inlined_call_operand.vmem [shape: f32[1,32], index: 4, kind: input, shape index: {}]   ;;  %s929_s5 = inlined_call_operand.vmem [shape: f32[1,32], index: 5, kind: input, shape index: {}]   ;;  %s930_s6 = inlined_call_operand.vmem [shape: f32[1,32], index: 6, kind: input, shape index: {}]   ;;  %s931_s7 = inlined_call_operand.hbm [shape: f32[32,32], index: 7, kind: output, shape index: {}]  }
   0x1   :  { %14 = vsyncpa [#allocation3 + $0x1], 0  ;;  %s785_s24 = smov 0   ;;  %s787_s25 = smov 0  }
   0x2   :  { %s789_s26 = smov 0   ;;  %s791_s27 = smov 0  }
   0x3 LB: > { %s806_s28 = sadd.s32 4294967295, %s738_s27   ;;  %s570_s29 = sadd.s32 4294967294, %s738_s27   ;;  %s738_s27 = sphi %s791_s27, %s937_s27   ;;  %s734_s26 = sphi %s789_s26, %s936_s26   ;;  %s730_s25 = sphi %s787_s25, %s935_s25   ;;  %s726_s24 = sphi %s785_s24, %s934_s24  }
   0x4   : > { %s810_s30 = sadd.s32 1, %s738_s27   ;;  %s179_s8 = sadd.s32 1, %s734_s26 }
   0x5   : > { %s176_s9 = ssub.s32 %s738_s27, %s810_s30  ;;  %p189_p0 = scmp.ne.s32.totalorder %s734_s26, %s730_s25 }
   0x6   : > { %p177_p1 = scmp.eq.s32.totalorder %s176_s9, 0  ;;  %p190_p2 = scmp.eq.s32.totalorder %s806_s28, 1 }
   0x7   : > { %p195_p3 = scmp.ne.s32.totalorder %s730_s25, %s726_s24  ;;  %p196_p4 = scmp.eq.s32.totalorder %s570_s29, 1 }
   0x8   : > { %s821_s10 = scalar_select %p177_p1, %s734_s26, %s179_s8  }
   0x9   : > { %p823_p5 = por %p190_p2, %p189_p0  ;;  %p827_p6 = por %p196_p4, %p195_p3 }
   0xa   : > { %p573_p7 = scmp.ge.s32.totalorder %s738_s27, 1  ;;  %p241_p8 = scmp.lt.s32.totalorder %s738_s27, 3 }
   0xc   : > { %p242_p9 = pnand %p573_p7, %p241_p8 }
   0xd   : > { %v666_v0 = vld [vmem:[%s925_s1] sm:$0xff] (!%p242_p9)   ;;  %v740_v1 = vmov (!%p242_p9), 0.0   ;;  %v667_v2 = vld [vmem:[%s925_s1 + $0x8] sm:$0xff] (!%p242_p9)   ;;  %vm741_vm0 = vmmov (!%p242_p9), 0   ;;  %s575_s17 = sshll.u32 (!%p242_p9), %s806_s28, 1  ;;  %vm307_vm1 = vcmask (!%p242_p9), 261120  }
   0xe   : > { %245 = sbr.rel (%p242_p9) target bundleno = 652 (0x28c), region = 48  ;;  %603 = vmatprep.subr.bf16.mxu0 (!%p242_p9), %v740_v1  ;;  %611 = vmatprep.subr.bf16.mxu1 (!%p242_p9), %v740_v1  ;;  %p274_p10 = scmp.lt.s32.totalorder (!%p242_p9), %s575_s17, 3  ;;  %v668_v3 = vld [vmem:[%s927_s3] sm:$0xff] (!%p242_p9)   ;;  %v669_v4 = vld [vmem:[%s927_s3 + $0x8] sm:$0xff] (!%p242_p9)   ;;  %v670_v8 = vld [vmem:[%s927_s3 + $0x10] sm:$0xff] (!%p242_p9)   ;;  %vm394_vm2 = vcmask (!%p242_p9), 523264  }
   0xf   : > { %604 = vmatpush3.bf16.msra.mxu0 (!%p242_p9), %v666_v0  ;;  %607 = vmatprep.mubr.msk.bf16.mxu0 (!%p242_p9), %vm741_vm0, %v740_v1  ;;  %v671_v9 = vld [vmem:[%s927_s3 + $0x18] sm:$0xff] (!%p242_p9)   ;;  %v577_v10 = vld [vmem:[%s926_s2] ss:$0 sm:$0xff] (!%p242_p9)  ;;  %s594_s9 = sshll.u32 (!%p242_p9), %s806_s28, 8  ;;  %s742_s19 = smov (!%p242_p9), [#allocation2]  }
  0x10   : > { %605 = vmatprep.subr.bf16.mxu0 (!%p242_p9), %v740_v1  ;;  %619 = vmatprep.mubr.msk.bf16.mxu1 (!%p242_p9), %vm741_vm0, %v740_v1  ;;  %v581_v20 = vld [vmem:[%s928_s4] ss:$0 sm:$0xff] (!%p242_p9)  ;;  %s680_s20 = sshll.u32 (!%p242_p9), %s742_s19, 4  ;;  %s681_s20 = int_to_ptr.vmem [resolvable:$false] %s680_s20 }
  0x11   : > { %612 = vmatpush3.bf16.msra.mxu1 (!%p242_p9), %v668_v3  ;;  %v587_v51 = vld [vmem:[%s929_s5] ss:$0 sm:$0xff] (!%p242_p9)  ;;  %s682_s21 = scalar_lea.vmem (!%p242_p9), %s681_s20, 512 }
  0x12   : > { %613 = vmatprep.subr.bf16.mxu1 (!%p242_p9), %v740_v1  ;;  %v588_v55 = vld [vmem:[%s930_s6] ss:$0 sm:$0xff] (!%p242_p9) }
  0x13   : > { %606 = vmatpush3.bf16.msra.mxu0 (!%p242_p9), %v667_v2 }
  0x15   : > { %s939_s17 = smov (!%p274_p10, %s575_s17), 3  ;;  %614 = vmatpush3.bf16.msra.mxu1 %v669_v4 }
  0x16   : > { %s576_s22 = sshll.u32 %s939_s17, 3  ;;  %615 = vmatprep.subr.bf16.mxu1 %v740_v1  ;;  %s878_s17 = scalar_lea.hbm %s931_s7, %s594_s9 }
  0x17   : > { %s277_s8 = scalar_lea.vmem %s924_s0, %s576_s22  ;;  %s270_s22 = sand.u32 1, %s730_s25  }
  0x18   : > { %v281_v5 = vld [vmem:[%s277_s8] sm:$0xff]  ;;  %v282_v6 = vld [vmem:[%s277_s8 + $0x8] sm:$0xff]  ;;  %s574_s23 = sshll.u32 %s270_s22, 4  ;;  %s883_s18 = scalar_lea.sflag [#allocation3], %s270_s22 }
  0x19   : > { %v283_v7 = vpack.c.bf16 %v282_v6, %v281_v5  ;;  %616 = vmatpush3.bf16.msra.mxu1 %v670_v8  ;;  %s272_s13 = scalar_lea.vmem [#allocation2], %s574_s23 }
  0x1a   : > { %617 = vmatprep.subr.bf16.mxu1 %v740_v1  ;;  %s508_s14 = sshll.u32 %s272_s13, 4  ;;  %s880_s14 = int_to_ptr.vmem [resolvable:$true] %s508_s14 }
  0x1b   : > { %608 = vmatmul.mubr.msk.bf16.vlgmr.msra.gmra.mrb[0].mxu0 %vm307_vm1, %v283_v7  ;;  %s676_s28 = scalar_lea.vmem %s880_s14, 256  ;;  %p683_p0 = scmp.lt.s32.totalorder %s880_s14, %s681_s20 }
  0x1c   : > { %p677_p11 = scmp.ne.s32.totalorder %s880_s14, %s676_s28  ;;  %p684_p1 = scmp.lt.s32.totalorder %s682_s21, %s676_s28 }
  0x1d   : > { %618 = vmatpush3.bf16.msra.mxu1 %v671_v9 }
  0x1e   : > { %p678_p12 = pnand %p677_p11, %p823_p5  ;;  %p685_p2 = por %p684_p1, %p683_p0 }
  0x20   : > { %p679_p13 = pneg %p678_p12 }
  0x22   : > { %p686_p3 = pnand %p685_p2, %p679_p13 }
  0xee   : > { %v345_v11 = vpop.f32.mrb[0].mxu0 }
  0xef   : > { %v346_v12 = vadd.f32 %v577_v10, %v345_v11  ;;  %v609_v13 = vpop.f32.mrb[1].mxu0 }
  0xf0   : > { %v348_v14 = vpop.f32.mrb[2].mxu0 }
  0xf1   : > { %v349_v15 = vadd.f32 %v577_v10, %v348_v14  ;;  %v610_v16 = vpop.f32.mrb[3].mxu0  ;;  %v352_v17 = vmax.f32 %v346_v12, 0.0 }
  0xf3   : > { %v353_v18 = vmax.f32 %v349_v15, 0.0 }
  0xf5   : > { %v354_v19 = vpack.c.bf16 %v353_v18, %v352_v17 }
  0xf7   : > { %620 = vmatmul.mubr.msk.bf16.vlgmr.msra.gmra.mrb[0].mxu1 %vm394_vm2, %v354_v19 }
 0x1ca   : > { %v432_v21 = vpop.f32.mrb[0].mxu1 }
 0x1cb   : > { %v433_v22 = vadd.f32 %v581_v20, %v432_v21  ;;  %v621_v23 = vpop.f32.mrb[1].mxu1 }
 0x1cc   : > { %v435_v24 = vpop.f32.mrb[2].mxu1 }
 0x1cd   : > { %v439_v25 = vadd.f32 %v433_v22, %v281_v5  ;;  %v436_v26 = vadd.f32 %v581_v20, %v435_v24  ;;  %v622_v27 = vpop.f32.mrb[3].mxu1 }
 0x1cf   : > { %v440_v28 = vadd.f32 %v436_v26, %v282_v6  ;;  %v441_v29 = vsel %vm307_vm1, %v439_v25, 0.0  ;;  %v450_v30 = vmul.f32 %v439_v25, %v439_v25 }
 0x1d0   : > { %442 = vadd.xlane.f32.xlu0 %v441_v29 }
 0x1d1   : > { %v452_v31 = vsel %vm307_vm1, %v450_v30, 0.0  ;;  %v451_v32 = vmul.f32 %v440_v28, %v440_v28  ;;  %v444_v33 = vsel %vm307_vm1, %v440_v28, 0.0 }
 0x1d2   : > { %453 = vadd.xlane.f32.xlu1 %v452_v31 }
 0x1d3   : > { %v455_v34 = vsel %vm307_vm1, %v451_v32, 0.0 }
 0x1d4   : > { %445 = vadd.xlane.f32.xlu0 %v444_v33 }
 0x1d6   : > { %456 = vadd.xlane.f32.xlu1 %v455_v34 }
 0x25d   : > { %v443_v35 = vpop.xlane.xlu0 %442 }
 0x25e   : > { %v448_v36 = vmul.f32 0.03125, %v443_v35 }
 0x25f   : > { %v454_v37 = vpop.xlane.xlu1 %453 }
 0x260   : > { %v460_v38 = vmul.f32 %v448_v36, %v448_v36  ;;  %v458_v39 = vmul.f32 0.03125, %v454_v37  ;;  %v479_v53 = vsub.f32 %v439_v25, %v448_v36 }
 0x261   : > { %v446_v40 = vpop.xlane.xlu0 %445 }
 0x262   : > { %v462_v41 = vsub.f32 %v458_v39, %v460_v38  ;;  %v449_v42 = vmul.f32 0.03125, %v446_v40 }
 0x263   : > { %v457_v43 = vpop.xlane.xlu1 %456 }
 0x264   : > { %v464_v44 = vmax.f32 %v462_v41, 0.0  ;;  %v461_v45 = vmul.f32 %v449_v42, %v449_v42  ;;  %v459_v46 = vmul.f32 0.03125, %v457_v43  ;;  %v480_v58 = vsub.f32 %v440_v28, %v449_v42 }
 0x266   : > { %v466_v47 = vadd.f32 1e-05, %v464_v44  ;;  %v463_v48 = vsub.f32 %v459_v46, %v461_v45 }
 0x268   : > { %672 = vrsqrt.f32 %v466_v47  ;;  %v465_v49 = vmax.f32 %v463_v48, 0.0 }
 0x26a   : > { %v467_v50 = vadd.f32 1e-05, %v465_v49 }
 0x26c   : > { %674 = vrsqrt.f32 %v467_v50 }
 0x272   : > { %v673_v52 = vpop.eup %672 }
 0x273   : > { %v477_v54 = vmul.f32 %v673_v52, %v587_v51 }
 0x275   : > { %v481_v56 = vmul.f32 %v479_v53, %v477_v54 }
 0x276   : > { %v675_v57 = vpop.eup %674 }
 0x277   : > { %v478_v59 = vmul.f32 %v675_v57, %v587_v51  ;;  %v490_v60 = vadd.f32 %v588_v55, %v481_v56 }
 0x279   : > { %v482_v61 = vmul.f32 %v480_v58, %v478_v59  ;;  %492 = vst.msk [vmem:[%s272_s13] sm:$0xff] %vm307_vm1, %v490_v60 }
 0x27b   : > { %v491_v62 = vadd.f32 %v588_v55, %v482_v61 }
 0x27d   : > { %493 = vst.msk [vmem:[%s272_s13 + $0x8] sm:$0xff] %vm307_vm1, %v491_v62 }
 0x27e   : > { %689 = shalt.err (!%p686_p3)
}
 0x27f   : > { %s690_s22 = scalar_lea.hbm %s878_s17, 256  ;;  %s694_s8 = scalar_lea.hbm %s931_s7, 512 }
 0x280   : > { %p691_p4 = scmp.ne.s32.totalorder %s878_s17, %s690_s22  ;;  %p695_p9 = scmp.lt.u32.totalorder %s878_s17, %s931_s7 }
 0x281   : > { %p696_p10 = scmp.lt.u32.totalorder %s694_s8, %s690_s22  ;;  %p698_p12 = scmp.lt.u32.totalorder %s690_s22, %s878_s17 }
 0x282   : > { %p692_p7 = pnand %p691_p4, %p823_p5 }
 0x283   : > { %p697_p11 = por %p696_p10, %p695_p9 }
 0x284   : > { %p693_p8 = pneg %p692_p7 }
 0x285   : > { %p699_p13 = por %p698_p12, %p697_p11 }
 0x287   : > { %p700_p0 = pnand %p699_p13, %p693_p8 }
 0x289   : > { %703 = shalt.err (!%p700_p0)
}
 0x28a   : > { %s743_s15 = smov 128   ;;  %s744_s16 = smov 8  }
 0x28b   : > { %623 = dma.vmem_to_hbm [thread:$0]  (%p823_p5), %s880_s14, 256, %s878_s17, %s883_s18, %s743_s15, %s743_s15, %s744_s16  }
 0x28c PF: > { %p629_p1 = scmp.ge.s32.totalorder %s738_s27, 2  ;;  %s523_s28 = sand.u32 1, %s726_s24  }
 0x28d   : > { %s524_s19 = scalar_lea.sflag [#allocation3], %s523_s28 }
 0x28e   : > { %p626_p2 = pnand %p629_p1, %p827_p6 }
 0x290   : > { %721 = dma.done.wait (!%p626_p2), %s524_s19, 256  }
 0x291   : > { %723 = vsyncadd (!%p626_p2), %s524_s19, 4294967040  ;;  %p17_p3 = scmp.ge.s32.totalorder %s810_s30, 4   ;;  %s934_s24 = smov %s730_s25 }
 0x292   : > { %s935_s25 = smov %s734_s26  ;;  %s936_s26 = smov %s821_s10 }
 0x293   : > { %s937_s27 = smov %s810_s30  ;;  %19 = sbr.rel (!%p17_p3) target bundleno = 3 (0x3), region = 83 }
 0x29a   :  { %529 = vsyncpa [#allocation3], 1 }
 0x29b   :  { %531 = vsyncpa [#allocation3 + $0x1], 1 }

</bundles_post_ra>
